<compile_context>
chip_gen: v5e
topology: v5e:2x2
jax: 0.10.0
libtpu: 0.0.40
codegen_flags: <defaults>
</compile_context>

<pallas_src>
import functools

import jax
import jax.numpy as jnp
from jax.experimental import pallas as pl
from jax.experimental.pallas import tpu as pltpu


def gnn_kernel(adj_ref, feat_ref, w1_ref, b1_ref, w2_ref, b2_ref, out_ref):
    GB, N, D = feat_ref.shape
    H = w1_ref.shape[1]

    # fc1 as one big MXU slab over every graph in the block:
    #   (GB*N, D) @ (D, H).   (GB, N, D) -> (GB*N, D) is a sublane concat.
    feats2d = feat_ref[...].reshape(GB * N, D)
    t = jnp.dot(feats2d, w1_ref[...], preferred_element_type=jnp.float32)   # (GB*N, H)
    t = t.reshape(GB, N, H)

    # Graph aggregation, batched per graph:  adj @ (features @ W1).
    h = jnp.einsum("gnm,gmh->gnh", adj_ref[...], t,
                   preferred_element_type=jnp.float32) + b1_ref[...]        # (GB, N, H)
    h = jnp.maximum(h, 0.0)

    # fc2: width-1 output -> VPU multiply + lane reduction (keeps MXU free);
    # b2 is a scalar read from SMEM.
    s = jnp.sum(h * w2_ref[...].astype(jnp.float32), axis=-1) + b2_ref[0, 0]  # (GB, N)

    # Single lane-dense store per grid step.
    out_ref[...] = s.reshape(1, 1, GB * N).astype(out_ref.dtype)


@functools.partial(jax.jit, static_argnames=("graphs_per_block", "compute_dtype"))
def simple_gnn_forward(features, adj, w1, b1, w2_row, b2,
                       *, graphs_per_block=None, compute_dtype=jnp.float32):
    """Batched SimpleGNN forward.

    features: (G, N, D)   adj: (G, N, N)
    w1: (D, H)  (fc1.weight.T)   b1: (1, H)
    w2_row: (1, H)  (fc2.weight) b2: (1, 1)
    returns scores: (G, N)  -- torch's x.squeeze() for each graph.
    """
    G, N, D = features.shape
    H = w1.shape[1]

    # Default GB: collapse the grid to 2 steps so the "parallel" graph axis
    # still shards across both TensorCores on v7x (1-TC chips just see a
    # 2-step loop, which is fine).
    if graphs_per_block is None:
        graphs_per_block = pl.cdiv(G, 2) if G > 1 else 1
    GB = max(1, min(int(graphs_per_block), G))
    num_blocks = pl.cdiv(G, GB)
    G_pad = num_blocks * GB
    if G_pad != G:
        pad = G_pad - G
        features = jnp.pad(features, ((0, pad), (0, 0), (0, 0)))
        adj = jnp.pad(adj, ((0, pad), (0, 0), (0, 0)))

    # Optional down-cast of the MXU operands (recommended bf16 on v6e/v7x for
    # large D/H); accumulation inside the kernel is always f32.
    adj_c = adj.astype(compute_dtype)
    feat_c = features.astype(compute_dtype)
    w1_c = w1.astype(compute_dtype)

    out = pl.pallas_call(
        gnn_kernel,
        out_shape=jax.ShapeDtypeStruct((num_blocks, 1, GB * N), jnp.float32),
        grid=(num_blocks,),
        in_specs=[
            pl.BlockSpec((GB, N, N), lambda g: (g, 0, 0)),       # adj, GB graphs/step
            pl.BlockSpec((GB, N, D), lambda g: (g, 0, 0)),       # features, GB graphs/step
            pl.BlockSpec((D, H), lambda g: (0, 0)),              # w1, shared
            pl.BlockSpec((1, H), lambda g: (0, 0)),              # b1, shared
            pl.BlockSpec((1, H), lambda g: (0, 0)),              # w2 row, shared
            pl.BlockSpec(memory_space=pltpu.MemorySpace.SMEM),   # b2 scalar
        ],
        out_specs=pl.BlockSpec((1, 1, GB * N), lambda g: (g, 0, 0)),
        compiler_params=pltpu.CompilerParams(
            dimension_semantics=("parallel",)),
    )(adj_c, feat_c, w1_c, b1, w2_row, b2)

    # (num_blocks, 1, GB*N) -> (G_pad, N) -> drop padding graphs.
    return out.reshape(G_pad, N)[:G]


def init_params(key, input_dim, hidden_dim):
    """Deterministic init mimicking nn.Linear default (uniform +/- 1/sqrt(fan_in))."""
    k1, k2, k3, k4 = jax.random.split(key, 4)
    bound1 = 1.0 / jnp.sqrt(jnp.float32(input_dim))
    bound2 = 1.0 / jnp.sqrt(jnp.float32(hidden_dim))
    # fc1 weight stored transposed: (in_dim, out_dim); fc2 weight kept as torch-native (1, H) row.
    w1 = jax.random.uniform(k1, (input_dim, hidden_dim), jnp.float32, -bound1, bound1)
    b1 = jax.random.uniform(k2, (1, hidden_dim), jnp.float32, -bound1, bound1)
    w2_row = jax.random.uniform(k3, (1, hidden_dim), jnp.float32, -bound2, bound2)
    b2 = jax.random.uniform(k4, (1, 1), jnp.float32, -bound2, bound2)
    return w1, b1, w2_row, b2


if __name__ == "__main__":
    # Synthetic batch: G=32 graphs, N=8 sentences, 64 TF-IDF feats, hidden=32.
    # Default GB = ceil(G/2) = 16  ->  2 grid steps, GB*N = 128 lane-dense output.
    G, N, INPUT_DIM, HIDDEN_DIM = 32, 8, 64, 32

    key = jax.random.PRNGKey(0)
    k_feat, k_adj, k_params = jax.random.split(key, 3)

    features = jax.random.uniform(k_feat, (G, N, INPUT_DIM), jnp.float32)
    # Symmetric adjacency with self-loops (typical sentence-similarity graphs).
    a = jax.random.uniform(k_adj, (G, N, N), jnp.float32)
    adj = (a + jnp.swapaxes(a, -1, -2)) * 0.5 + jnp.eye(N, dtype=jnp.float32)

    w1, b1, w2_row, b2 = init_params(k_params, INPUT_DIM, HIDDEN_DIM)

    scores = simple_gnn_forward(features, adj, w1, b1, w2_row, b2)
    jax.block_until_ready(scores)

    # Pure-JAX reference of the same math (original association), per graph.
    agg = jnp.einsum("gnm,gmd->gnd", adj, features)
    hid = jnp.maximum(jnp.einsum("gnd,dh->gnh", agg, w1) + b1, 0.0)
    ref = jnp.einsum("gnh,h->gn", hid, w2_row[0]) + b2[0, 0]

    assert scores.shape == (G, N)
    assert jnp.allclose(scores, ref, atol=1e-4, rtol=1e-4), float(
        jnp.max(jnp.abs(scores - ref))
    )
    print("KERNEL_OK")
</pallas_src>

<mosaic_0001>
module attributes {stable_mosaic.version = 11 : i64} {
  func.func @gnn_kernel(%arg0: i32, %arg1: memref<16x8x8xf32, #tpu.memory_space<vmem>>, %arg2: memref<16x8x64xf32, #tpu.memory_space<vmem>>, %arg3: memref<64x32xf32, #tpu.memory_space<vmem>>, %arg4: memref<1x32xf32, #tpu.memory_space<vmem>>, %arg5: memref<1x32xf32, #tpu.memory_space<vmem>>, %arg6: memref<1x1xf32, #tpu.memory_space<smem>>, %arg7: memref<1x1x128xf32, #tpu.memory_space<vmem>>) attributes {dimension_semantics = [#tpu.dimension_semantics<parallel>], iteration_bounds = array<i64: 2>, scalar_prefetch = 0 : i64, scratch_operands = 0 : i64, tpu.core_type = #tpu.core_type<tc>, window_params = [{transform_indices = @transform_0, window_bounds = array<i64: 16, 8, 8>}, {transform_indices = @transform_1, window_bounds = array<i64: 16, 8, 64>}, {pipeline_mode = #tpu.pipeline_mode<synchronous>, transform_indices = @transform_2, window_bounds = array<i64: 64, 32>}, {pipeline_mode = #tpu.pipeline_mode<synchronous>, transform_indices = @transform_3, window_bounds = array<i64: 1, 32>}, {pipeline_mode = #tpu.pipeline_mode<synchronous>, transform_indices = @transform_4, window_bounds = array<i64: 1, 32>}, {transform_indices = @transform_5, window_bounds = array<i64: 1, 1>}, {transform_indices = @transform_6, window_bounds = array<i64: 1, 1, 128>}]} {
    %c0 = arith.constant 0 : index
    %c0_0 = arith.constant 0 : index
    %c0_1 = arith.constant 0 : index
    %0 = vector.load %arg2[%c0, %c0_0, %c0_1] : memref<16x8x64xf32, #tpu.memory_space<vmem>>, vector<16x8x64xf32>
    %1 = vector.shape_cast %0 : vector<16x8x64xf32> to vector<128x64xf32>
    %c0_2 = arith.constant 0 : index
    %c0_3 = arith.constant 0 : index
    %2 = vector.load %arg3[%c0_2, %c0_3] : memref<64x32xf32, #tpu.memory_space<vmem>>, vector<64x32xf32>
    %cst = arith.constant dense<0.000000e+00> : vector<128x32xf32>
    %3 = tpu.matmul %1, %2, %cst {dimension_numbers = #tpu.dot_dimension_numbers<[1], [0], [0], [1], [0, 0, 1, 1], [], []>} : vector<128x64xf32>, vector<64x32xf32>, vector<128x32xf32> -> vector<128x32xf32>
    %4 = vector.shape_cast %3 : vector<128x32xf32> to vector<16x8x32xf32>
    %c0_4 = arith.constant 0 : index
    %c0_5 = arith.constant 0 : index
    %c0_6 = arith.constant 0 : index
    %5 = vector.load %arg1[%c0_4, %c0_5, %c0_6] : memref<16x8x8xf32, #tpu.memory_space<vmem>>, vector<16x8x8xf32>
    "tpu.trace_start"() <{level = 10 : i32, message = "gnm,gmh->gnh"}> : () -> ()
    %cst_7 = arith.constant dense<0.000000e+00> : vector<16x8x32xf32>
    %6 = tpu.matmul %5, %4, %cst_7 {dimension_numbers = #tpu.dot_dimension_numbers<[2], [1], [1], [2], [0, 0, 0, 1, 1, 2], [0], [0]>} : vector<16x8x8xf32>, vector<16x8x32xf32>, vector<16x8x32xf32> -> vector<16x8x32xf32>
    "tpu.trace_stop"() : () -> ()
    %c0_8 = arith.constant 0 : index
    %c0_9 = arith.constant 0 : index
    %7 = vector.load %arg4[%c0_8, %c0_9] : memref<1x32xf32, #tpu.memory_space<vmem>>, vector<1x32xf32>
    %8 = vector.shape_cast %7 : vector<1x32xf32> to vector<1x1x32xf32>
    %9 = vector.broadcast %8 : vector<1x1x32xf32> to vector<16x8x32xf32>
    %10 = arith.addf %6, %9 : vector<16x8x32xf32>
    %cst_10 = arith.constant 0.000000e+00 : f32
    %11 = vector.broadcast %cst_10 : f32 to vector<16x8x32xf32>
    %12 = arith.maximumf %10, %11 : vector<16x8x32xf32>
    %c0_11 = arith.constant 0 : index
    %c0_12 = arith.constant 0 : index
    %13 = vector.load %arg5[%c0_11, %c0_12] : memref<1x32xf32, #tpu.memory_space<vmem>>, vector<1x32xf32>
    %14 = vector.shape_cast %13 : vector<1x32xf32> to vector<1x1x32xf32>
    %15 = vector.broadcast %14 : vector<1x1x32xf32> to vector<16x8x32xf32>
    %16 = arith.mulf %12, %15 : vector<16x8x32xf32>
    %cst_13 = arith.constant dense<0.000000e+00> : vector<16x8xf32>
    %17 = vector.multi_reduction <add>, %16, %cst_13 [2] : vector<16x8x32xf32> to vector<16x8xf32>
    %c0_14 = arith.constant 0 : index
    %c0_15 = arith.constant 0 : index
    %18 = memref.load %arg6[%c0_14, %c0_15] : memref<1x1xf32, #tpu.memory_space<smem>>
    %19 = vector.broadcast %18 : f32 to vector<16x8xf32>
    %20 = arith.addf %17, %19 : vector<16x8xf32>
    %21 = vector.shape_cast %20 : vector<16x8xf32> to vector<1x1x128xf32>
    %c0_16 = arith.constant 0 : index
    %c0_17 = arith.constant 0 : index
    %c0_18 = arith.constant 0 : index
    %22 = vector.load %arg7[%c0_16, %c0_17, %c0_18] : memref<1x1x128xf32, #tpu.memory_space<vmem>>, vector<1x1x128xf32>
    tpu.vector_store %arg7[%c0_16, %c0_17, %c0_18], %21 {strides = array<i32>} : memref<1x1x128xf32, #tpu.memory_space<vmem>>, vector<1x1x128xf32>,
    return
  }
  func.func @transform_0(%arg0: i32) -> (i32, i32, i32) {
    %c0_i32 = arith.constant 0 : i32
    %c0_i32_0 = arith.constant 0 : i32
    %c0_i32_1 = arith.constant 0 : i32
    return %arg0, %c0_i32, %c0_i32_0 : i32, i32, i32
  }
  func.func @transform_1(%arg0: i32) -> (i32, i32, i32) {
    %c0_i32 = arith.constant 0 : i32
    %c0_i32_0 = arith.constant 0 : i32
    %c0_i32_1 = arith.constant 0 : i32
    return %arg0, %c0_i32, %c0_i32_0 : i32, i32, i32
  }
  func.func @transform_2(%arg0: i32) -> (i32, i32) {
    %c0_i32 = arith.constant 0 : i32
    %c0_i32_0 = arith.constant 0 : i32
    %c0_i32_1 = arith.constant 0 : i32
    return %c0_i32, %c0_i32_0 : i32, i32
  }
  func.func @transform_3(%arg0: i32) -> (i32, i32) {
    %c0_i32 = arith.constant 0 : i32
    %c0_i32_0 = arith.constant 0 : i32
    %c0_i32_1 = arith.constant 0 : i32
    return %c0_i32, %c0_i32_0 : i32, i32
  }
  func.func @transform_4(%arg0: i32) -> (i32, i32) {
    %c0_i32 = arith.constant 0 : i32
    %c0_i32_0 = arith.constant 0 : i32
    %c0_i32_1 = arith.constant 0 : i32
    return %c0_i32, %c0_i32_0 : i32, i32
  }
  func.func @transform_5(%arg0: i32) -> (i32, i32) {
    %c0_i32 = arith.constant 0 : i32
    %c0_i32_0 = arith.constant 0 : i32
    %c0_i32_1 = arith.constant 0 : i32
    return %c0_i32, %c0_i32_0 : i32, i32
  }
  func.func @transform_6(%arg0: i32) -> (i32, i32, i32) {
    %c0_i32 = arith.constant 0 : i32
    %c0_i32_0 = arith.constant 0 : i32
    %c0_i32_1 = arith.constant 0 : i32
    return %arg0, %c0_i32, %c0_i32_0 : i32, i32, i32
  }
}

</mosaic_0001>

<bundles_post_ra>
// kernel: simple_gnn_forward.1
= control target key start
LH: loop header
LB: loop body
LE: loop exit
PB: predicated region body
PF: predicated region fallthrough
CT: control target
= control target key end

     0   :  { %s1166_s23 = smov 0   ;;  %s1384_s0 = inlined_call_operand.vmem [shape: f32[32,8,8], index: 0, kind: input, shape index: {}]   ;;  %s1385_s1 = inlined_call_operand.vmem [shape: f32[32,8,64], index: 1, kind: input, shape index: {}]   ;;  %s1386_s2 = inlined_call_operand.vmem [shape: f32[64,32], index: 2, kind: input, shape index: {}]   ;;  %s1387_s3 = inlined_call_operand.vmem [shape: f32[1,32], index: 3, kind: input, shape index: {}]   ;;  %s1388_s4 = inlined_call_operand.vmem [shape: f32[1,32], index: 4, kind: input, shape index: {}]   ;;  %s1389_s5 = inlined_call_operand.<no memory space> [shape: f32[1,1], index: 5, kind: input, shape index: {}]   ;;  %s1390_s6 = inlined_call_operand.vmem [shape: f32[2,1,128], index: 6, kind: output, shape index: {}]  }
   0x1   :  { %11 = sst [smem:[#allocation2]] %s1389_s5 }
   0x2 LB: > { %s1172_s24 = sadd.s32 4294967295, %s1126_s23   ;;  %p1047_p0 = scmp.ge.s32.totalorder %s1126_s23, 1  ;;  %s1126_s23 = sphi %s1166_s23, %s17_s23  }
   0x3   : > { %p225_p1 = scmp.lt.s32.totalorder %s1126_s23, 3 }
   0x5   : > { %p226_p2 = pnand %p1047_p0, %p225_p1 }
   0x6   : > { %s1048_s28 = sshll.u32 (!%p226_p2), %s1172_s24, 4  ;;  %s885_s29 = sld [smem:[#allocation2]] (!%p226_p2) }
   0x7   : > { %229 = sbr.rel (%p226_p2) target bundleno = 490 (0x1ea), region = 44  ;;  %p259_p3 = scmp.lt.s32.totalorder (!%p226_p2), %s1048_s28, 31 }
   0x8   : > { %p270_p4 = scmp.lt.s32.totalorder (!%p226_p2), %s1172_s24, 1 }
   0xc   : > { %v296_v0 = vld [vmem:[%s1386_s2 + $0x38] sm:$0xff]  ;;  %v295_v1 = vld [vmem:[%s1386_s2 + $0x30] sm:$0xff]  ;;  %v294_v2 = vld [vmem:[%s1386_s2 + $0x28] sm:$0xff]  ;;  %s1392_s28 = smov (!%p259_p3, %s1048_s28), 31  ;;  %vm297_vm0 = vcmask 523264   ;;  %vm431_vm1 = vcmask 64512  }
   0xd   : > { %354 = vmatpush.msra.mxu0 %v296_v0  ;;  %1087 = vmatpush.msra.mxu2 %v296_v0  ;;  %v293_v3 = vld [vmem:[%s1386_s2 + $0x20] sm:$0xff]  ;;  %v292_v4 = vld [vmem:[%s1386_s2 + $0x18] sm:$0xff]  ;;  %s1049_s11 = sshll.u32 %s1392_s28, 3  ;;  %v291_v5 = vld [vmem:[%s1386_s2 + $0x10] sm:$0xff]  ;;  %vm836_vm2 = vcmask 261120   ;;  %vm924_vm3 = vcmask 130112  }
   0xe   : > { %1086 = vmatpush.msra.mxu1 %v296_v0  ;;  %1088 = vmatpush.msra.mxu3 %v296_v0  ;;  %v290_v6 = vld [vmem:[%s1386_s2 + $0x8] sm:$0xff]  ;;  %s1206_s18 = scalar_lea.vmem %s1385_s1, %s1049_s11  ;;  %v289_v7 = vld [vmem:[%s1386_s2] sm:$0xff]  ;;  %s1248_s25 = scalar_lea.vmem %s1384_s0, %s1049_s11  ;;  %vm928_vm4 = vcmask 195712   ;;  %vm932_vm5 = vcmask 261312   ;;  %vm936_vm6 = vcmask 326912   ;;  %vm940_vm7 = vcmask 392512  }
   0xf   : > { %355 = vmatpush.msra.mxu0 %v295_v1  ;;  %1090 = vmatpush.msra.mxu2 %v295_v1  ;;  %v273_v8 = vld [vmem:[%s1206_s18] sm:$0xff]  ;;  %v274_v9 = vld [vmem:[%s1206_s18 + $0x8] sm:$0xff]  ;;  %v275_v10 = vld [vmem:[%s1206_s18 + $0x10] sm:$0xff]  ;;  %vm944_vm8 = vcmask 458112   ;;  %vm948_vm9 = vcmask 523712   ;;  %vm952_vm10 = vcmask 589312  }
  0x10   : > { %1089 = vmatpush.msra.mxu1 %v295_v1  ;;  %1091 = vmatpush.msra.mxu3 %v295_v1  ;;  %v283_v11 = vld [vmem:[%s1206_s18 + $0x50] sm:$0xff]  ;;  %v276_v12 = vld [vmem:[%s1206_s18 + $0x18] sm:$0xff]  ;;  %v281_v13 = vld [vmem:[%s1206_s18 + $0x40] sm:$0xff]  ;;  %vm956_vm11 = vcmask 654912   ;;  %vm960_vm12 = vcmask 720512   ;;  %vm964_vm13 = vcmask 786112  }
  0x11   : > { %356 = vmatpush.msra.mxu0 %v294_v2  ;;  %1093 = vmatpush.msra.mxu2 %v294_v2  ;;  %v284_v14 = vld [vmem:[%s1206_s18 + $0x58] sm:$0xff]  ;;  %v286_v15 = vld [vmem:[%s1206_s18 + $0x68] sm:$0xff]  ;;  %v277_v16 = vld [vmem:[%s1206_s18 + $0x20] sm:$0xff]  ;;  %vm968_vm14 = vcmask 851712   ;;  %s1394_s24 = smov (!%p270_p4, %s1172_s24), 1  ;;  %vm972_vm15 = vcmask 917312  }
  0x12   : > { %1092 = vmatpush.msra.mxu1 %v294_v2  ;;  %1094 = vmatpush.msra.mxu3 %v294_v2  ;;  %v282_v17 = vld [vmem:[%s1206_s18 + $0x48] sm:$0xff]  ;;  %v285_v18 = vld [vmem:[%s1206_s18 + $0x60] sm:$0xff]  ;;  %v287_v19 = vld [vmem:[%s1206_s18 + $0x70] sm:$0xff]  ;;  %s272_s8 = scalar_lea.vmem %s1390_s6, %s1394_s24 }
  0x13   : > { %357 = vmatpush.msra.mxu0 %v293_v3  ;;  %1096 = vmatpush.msra.mxu2 %v293_v3  ;;  %v278_v20 = vld [vmem:[%s1206_s18 + $0x28] sm:$0xff]  ;;  %v288_v21 = vld [vmem:[%s1206_s18 + $0x78] sm:$0xff]  ;;  %v279_v22 = vld [vmem:[%s1206_s18 + $0x30] sm:$0xff] }
  0x14   : > { %1095 = vmatpush.msra.mxu1 %v293_v3  ;;  %1097 = vmatpush.msra.mxu3 %v293_v3  ;;  %v280_v23 = vld [vmem:[%s1206_s18 + $0x38] sm:$0xff]  ;;  %v411_v25 = vld [vmem:[%s1248_s25] sm:$0xff]  ;;  %v412_v26 = vld [vmem:[%s1248_s25 + $0x8] sm:$0xff] }
  0x15   : > { %358 = vmatpush.msra.mxu0 %v292_v4  ;;  %1099 = vmatpush.msra.mxu2 %v292_v4  ;;  %v413_v28 = vld [vmem:[%s1248_s25 + $0x10] sm:$0xff]  ;;  %v414_v30 = vld [vmem:[%s1248_s25 + $0x18] sm:$0xff]  ;;  %v415_v33 = vld [vmem:[%s1248_s25 + $0x20] sm:$0xff] }
  0x16   : > { %1098 = vmatpush.msra.mxu1 %v292_v4  ;;  %1100 = vmatpush.msra.mxu3 %v292_v4  ;;  %v416_v37 = vld [vmem:[%s1248_s25 + $0x28] sm:$0xff]  ;;  %v417_v40 = vld [vmem:[%s1248_s25 + $0x30] sm:$0xff]  ;;  %v419_v41 = vld [vmem:[%s1248_s25 + $0x40] sm:$0xff] }
  0x17   : > { %359 = vmatpush.msra.mxu0 %v291_v5  ;;  %1102 = vmatpush.msra.mxu2 %v291_v5  ;;  %v418_v46 = vld [vmem:[%s1248_s25 + $0x38] sm:$0xff]  ;;  %v420_v47 = vld [vmem:[%s1248_s25 + $0x48] sm:$0xff]  ;;  %v421_v51 = vld [vmem:[%s1248_s25 + $0x50] sm:$0xff] }
  0x18   : > { %1101 = vmatpush.msra.mxu1 %v291_v5  ;;  %1103 = vmatpush.msra.mxu3 %v291_v5  ;;  %v422_v49 = vld [vmem:[%s1248_s25 + $0x58] sm:$0xff]  ;;  %v423_v52 = vld [vmem:[%s1248_s25 + $0x60] sm:$0xff]  ;;  %v425_v53 = vld [vmem:[%s1248_s25 + $0x70] sm:$0xff] }
  0x19   : > { %360 = vmatpush.msra.mxu0 %v290_v6  ;;  %1105 = vmatpush.msra.mxu2 %v290_v6  ;;  %v424_v54 = vld [vmem:[%s1248_s25 + $0x68] sm:$0xff]  ;;  %v426_v55 = vld [vmem:[%s1248_s25 + $0x78] sm:$0xff]  ;;  %v1285_v56 = vld [vmem:[%s1387_s3] ss:$0 sm:$0xff] }
  0x1a   : > { %1104 = vmatpush.msra.mxu1 %v290_v6  ;;  %1106 = vmatpush.msra.mxu3 %v290_v6  ;;  %v1291_v60 = vld [vmem:[%s1388_s4] ss:$0 sm:$0xff] }
  0x1b   : > { %361 = vmatpush.msra.mxu0 %v289_v7  ;;  %1108 = vmatpush.msra.mxu2 %v289_v7 }
  0x1c   : > { %1052 = vmatmul.msk.f32.vlgmr.msra.gmra.mxu0 %vm297_vm0, %v273_v8  ;;  %1107 = vmatpush.msra.mxu1 %v289_v7 }
  0x1d   : > { %1109 = vmatpush.msra.mxu3 %v289_v7  ;;  %1062 = vmatmul.msk.f32.vlgmr.msra.gmra.mxu2 %vm297_vm0, %v283_v11 }
  0x1e   : > { %1060 = vmatmul.msk.f32.vlgmr.msra.gmra.mxu1 %vm297_vm0, %v281_v13  ;;  %1065 = vmatmul.msk.f32.vlgmr.msra.gmra.mxu3 %vm297_vm0, %v286_v15 }
  0x24   : > { %1053 = vmatmul.msk.f32.gmra.mxu0 %vm297_vm0, %v274_v9 }
  0x25   : > { %1063 = vmatmul.msk.f32.gmra.mxu2 %vm297_vm0, %v284_v14 }
  0x26   : > { %1061 = vmatmul.msk.f32.gmra.mxu1 %vm297_vm0, %v282_v17  ;;  %1066 = vmatmul.msk.f32.gmra.mxu3 %vm297_vm0, %v287_v19 }
  0x2c   : > { %1054 = vmatmul.msk.f32.gmra.mxu0 %vm297_vm0, %v275_v10 }
  0x2d   : > { %1064 = vmatmul.msk.f32.gmra.mxu2 %vm297_vm0, %v285_v18 }
  0x2e   : > { %1067 = vmatmul.msk.f32.gmra.mxu3 %vm297_vm0, %v288_v21 }
  0x34   : > { %1055 = vmatmul.msk.f32.gmra.mxu0 %vm297_vm0, %v276_v12 }
  0x3c   : > { %1056 = vmatmul.msk.f32.gmra.mxu0 %vm297_vm0, %v277_v16 }
  0x44   : > { %1057 = vmatmul.msk.f32.gmra.mxu0 %vm297_vm0, %v278_v20 }
  0x4c   : > { %1058 = vmatmul.msk.f32.gmra.mxu0 %vm297_vm0, %v279_v22 }
  0x54   : > { %1059 = vmatmul.msk.f32.gmra.mxu0 %vm297_vm0, %v280_v23  ;;  %vm976_vm0 = vcmask 982912  }
  0x99   : > { %v363_v24 = vpop.f32.mrf.mxu0 }
  0x9a   : > { %450 = vmatpush.msrb.mxu1 %v363_v24 }
  0x9b   : > { %1068 = vmatmul.msk.f32.vlgmr.msrb.gmra.mxu1 %vm431_vm1, %v411_v25  ;;  %v387_v36 = vpop.f32.mrf.mxu1 }
  0xa0   : > { %v393_v32 = vpop.f32.mrf.mxu2 }
  0xa1   : > { %v366_v27 = vpop.f32.mrf.mxu0  ;;  %v402_v35 = vpop.f32.mrf.mxu3 }
  0xa2   : > { %473 = vmatpush.msrb.mxu2 %v366_v27 }
  0xa3   : > { %1069 = vmatmul.msk.f32.vlgmr.msrb.gmra.mxu2 %vm431_vm1, %v412_v26  ;;  %v390_v44 = vpop.f32.mrf.mxu1 }
  0xa8   : > { %v396_v38 = vpop.f32.mrf.mxu2 }
  0xa9   : > { %v369_v29 = vpop.f32.mrf.mxu0  ;;  %v405_v42 = vpop.f32.mrf.mxu3 }
  0xaa   : > { %496 = vmatpush.msrb.mxu3 %v369_v29 }
  0xab   : > { %1070 = vmatmul.msk.f32.vlgmr.msrb.gmra.mxu3 %vm431_vm1, %v413_v28 }
  0xb0   : > { %v399_v45 = vpop.f32.mrf.mxu2 }
  0xb1   : > { %v372_v31 = vpop.f32.mrf.mxu0  ;;  %v408_v50 = vpop.f32.mrf.mxu3 }
  0xb2   : > { %519 = vmatpush.msra.mxu1 %v372_v31 }
  0xb3   : > { %1071 = vmatmul.msk.f32.vlgmr.msra.gmra.mxu1 %vm431_vm1, %v414_v30 }
  0xb9   : > { %v375_v34 = vpop.f32.mrf.mxu0 }
  0xba   : > { %542 = vmatpush.msra.mxu2 %v375_v34 }
  0xbb   : > { %1072 = vmatmul.msk.f32.vlgmr.msra.gmra.mxu2 %vm431_vm1, %v415_v33 }
  0xc1   : > { %v378_v39 = vpop.f32.mrf.mxu0 }
  0xc2   : > { %565 = vmatpush.msra.mxu3 %v378_v39 }
  0xc3   : > { %1073 = vmatmul.msk.f32.vlgmr.msra.gmra.mxu3 %vm431_vm1, %v416_v37 }
  0xc4   : > { %634 = vmatpush.msrb.mxu3 %v387_v36 }
  0xc6   : > { %703 = vmatpush.msra.mxu3 %v396_v38 }
  0xc9   : > { %v381_v43 = vpop.f32.mrf.mxu0 }
  0xca   : > { %588 = vmatpush.msrb.mxu1 %v381_v43 }
  0xcb   : > { %1074 = vmatmul.msk.f32.vlgmr.msrb.gmra.mxu1 %vm431_vm1, %v417_v40  ;;  %1076 = vmatmul.msk.f32.vlgmr.msrb.gmra.mxu3 %vm431_vm1, %v419_v41 }
  0xcc   : > { %657 = vmatpush.msra.mxu1 %v390_v44  ;;  %772 = vmatpush.msrb.mxu3 %v405_v42 }
  0xce   : > { %726 = vmatpush.msrb.mxu1 %v399_v45 }
  0xd1   : > { %v384_v48 = vpop.f32.mrf.mxu0 }
  0xd2   : > { %611 = vmatpush.msrb.mxu2 %v384_v48 }
  0xd3   : > { %1075 = vmatmul.msk.f32.vlgmr.msrb.gmra.mxu2 %vm431_vm1, %v418_v46  ;;  %1077 = vmatmul.msk.f32.vlgmr.msra.gmra.mxu1 %vm431_vm1, %v420_v47 }
  0xd4   : > { %680 = vmatpush.msra.mxu2 %v393_v32  ;;  %1079 = vmatmul.msk.f32.vlgmr.msra.gmra.mxu3 %vm431_vm1, %v422_v49 }
  0xd5   : > { %795 = vmatpush.msra.mxu1 %v408_v50 }
  0xd6   : > { %749 = vmatpush.msrb.mxu2 %v402_v35 }
  0xdb   : > { %1078 = vmatmul.msk.f32.vlgmr.msra.gmra.mxu2 %vm431_vm1, %v421_v51  ;;  %1080 = vmatmul.msk.f32.vlgmr.msrb.gmra.mxu1 %vm431_vm1, %v423_v52 }
  0xdc   : > { %1082 = vmatmul.msk.f32.vlgmr.msrb.gmra.mxu3 %vm431_vm1, %v425_v53 }
  0xe3   : > { %1081 = vmatmul.msk.f32.vlgmr.msrb.gmra.mxu2 %vm431_vm1, %v424_v54  ;;  %1083 = vmatmul.msk.f32.vlgmr.msra.gmra.mxu1 %vm431_vm1, %v426_v55  ;;  %vm980_vm1 = vcmask 1048512  }
 0x118   : > { %v452_v57 = vpop.f32.mrf.mxu1 }
 0x119   : > { %v453_v58 = vadd.f32 %v1285_v56, %v452_v57 }
 0x11b   : > { %v800_v59 = vmax.f32 %v453_v58, 0.0 }
 0x11d   : > { %v820_v61 = vmul.f32 %v1291_v60, %v800_v59 }
 0x11f   : > { %v837_v62 = vsel %vm836_vm2, %v820_v61, 0.0 }
 0x120   : > { %838 = vadd.xlane.f32.xlu0 %v837_v62 }
 0x126   : > { %v475_v63 = vpop.f32.mrf.mxu2 }
 0x127   : > { %v476_v0 = vadd.f32 %v1285_v56, %v475_v63 }
 0x129   : > { %v801_v1 = vmax.f32 %v476_v0, 0.0 }
 0x12b   : > { %v821_v2 = vmul.f32 %v1291_v60, %v801_v1 }
 0x12d   : > { %v840_v3 = vsel %vm836_vm2, %v821_v2, 0.0 }
 0x12e   : > { %v498_v4 = vpop.f32.mrf.mxu3  ;;  %841 = vadd.xlane.f32.xlu0 %v840_v3 }
 0x12f   : > { %v499_v5 = vadd.f32 %v1285_v56, %v498_v4 }
 0x130   : > { %v521_v6 = vpop.f32.mrf.mxu1 }
 0x131   : > { %v802_v7 = vmax.f32 %v499_v5, 0.0  ;;  %v522_v8 = vadd.f32 %v1285_v56, %v521_v6 }
 0x133   : > { %v803_v9 = vmax.f32 %v522_v8, 0.0  ;;  %v822_v10 = vmul.f32 %v1291_v60, %v802_v7 }
 0x135   : > { %v843_v11 = vsel %vm836_vm2, %v822_v10, 0.0  ;;  %v823_v12 = vmul.f32 %v1291_v60, %v803_v9 }
 0x136   : > { %844 = vadd.xlane.f32.xlu1 %v843_v11 }
 0x137   : > { %v846_v13 = vsel %vm836_vm2, %v823_v12, 0.0 }
 0x13e   : > { %v544_v14 = vpop.f32.mrf.mxu2  ;;  %847 = vadd.xlane.f32.xlu1 %v846_v13 }
 0x13f   : > { %v545_v15 = vadd.f32 %v1285_v56, %v544_v14 }
 0x141   : > { %v804_v16 = vmax.f32 %v545_v15, 0.0  ;;  %v919_v15 = vlaneseq }
 0x143   : > { %v824_v17 = vmul.f32 %v1291_v60, %v804_v16 }
 0x145   : > { %v849_v18 = vsel %vm836_vm2, %v824_v17, 0.0  ;;  %v1340_v17 = vand.u32 127, %v919_v15 }
 0x146   : > { %v567_v19 = vpop.f32.mrf.mxu3  ;;  %850 = vadd.xlane.f32.xlu2 %v849_v18  ;;  %v1342_v18 = vstv %s885_s29 }
 0x147   : > { %v568_v20 = vadd.f32 %v1285_v56, %v567_v19  ;;  %v970_v15 = vadd.s32 4294967192, %v1340_v17 }
 0x148   : > { %v590_v21 = vpop.f32.mrf.mxu1 }
 0x149   : > { %v805_v22 = vmax.f32 %v568_v20, 0.0  ;;  %v591_v23 = vadd.f32 %v1285_v56, %v590_v21  ;;  %v922_v20 = vadd.s32 4294967288, %v1340_v17 }
 0x14b   : > { %v806_v24 = vmax.f32 %v591_v23, 0.0  ;;  %v825_v25 = vmul.f32 %v1291_v60, %v805_v22  ;;  %v926_v22 = vadd.s32 4294967280, %v1340_v17 }
 0x14d   : > { %v852_v26 = vsel %vm836_vm2, %v825_v25, 0.0  ;;  %v826_v27 = vmul.f32 %v1291_v60, %v806_v24 }
 0x14e   : > { %853 = vadd.xlane.f32.xlu2 %v852_v26  ;;  %v636_v28 = vpop.f32.mrf.mxu3 }
 0x14f   : > { %v855_v29 = vsel %vm836_vm2, %v826_v27, 0.0  ;;  %v637_v30 = vadd.f32 %v1285_v56, %v636_v28  ;;  %v930_v27 = vadd.s32 4294967272, %v1340_v17 }
 0x150   : > { %856 = vadd.xlane.f32.xlu0 %v855_v29  ;;  %v659_v31 = vpop.f32.mrf.mxu1 }
 0x151   : > { %v808_v32 = vmax.f32 %v637_v30, 0.0  ;;  %v660_v33 = vadd.f32 %v1285_v56, %v659_v31 }
 0x153   : > { %v809_v34 = vmax.f32 %v660_v33, 0.0  ;;  %v828_v35 = vmul.f32 %v1291_v60, %v808_v32  ;;  %v934_v32 = vadd.s32 4294967264, %v1340_v17 }
 0x155   : > { %v861_v36 = vsel %vm836_vm2, %v828_v35, 0.0  ;;  %v829_v37 = vmul.f32 %v1291_v60, %v809_v34 }
 0x156   : > { %v613_v38 = vpop.f32.mrf.mxu2  ;;  %862 = vadd.xlane.f32.xlu2 %v861_v36  ;;  %v938_v36 = vadd.s32 4294967256, %v1340_v17 }
 0x157   : > { %v614_v39 = vadd.f32 %v1285_v56, %v613_v38  ;;  %v705_v40 = vpop.f32.mrf.mxu3  ;;  %v864_v41 = vsel %vm836_vm2, %v829_v37, 0.0 }
 0x158   : > { %v706_v42 = vadd.f32 %v1285_v56, %v705_v40  ;;  %v728_v43 = vpop.f32.mrf.mxu1  ;;  %865 = vadd.xlane.f32.xlu0 %v864_v41  ;;  %v942_v40 = vadd.s32 4294967248, %v1340_v17 }
 0x159   : > { %v807_v44 = vmax.f32 %v614_v39, 0.0  ;;  %v729_v45 = vadd.f32 %v1285_v56, %v728_v43 }
 0x15a   : > { %v811_v46 = vmax.f32 %v706_v42, 0.0 }
 0x15b   : > { %v827_v47 = vmul.f32 %v1291_v60, %v807_v44  ;;  %v812_v48 = vmax.f32 %v729_v45, 0.0  ;;  %v946_v44 = vadd.s32 4294967240, %v1340_v17 }
 0x15c   : > { %v831_v49 = vmul.f32 %v1291_v60, %v811_v46 }
 0x15d   : > { %v858_v50 = vsel %vm836_vm2, %v827_v47, 0.0  ;;  %v832_v51 = vmul.f32 %v1291_v60, %v812_v48 }
 0x15e   : > { %v682_v52 = vpop.f32.mrf.mxu2  ;;  %859 = vadd.xlane.f32.xlu1 %v858_v50  ;;  %v870_v53 = vsel %vm836_vm2, %v831_v49, 0.0  ;;  %v950_v50 = vadd.s32 4294967232, %v1340_v17 }
 0x15f   : > { %v683_v54 = vadd.f32 %v1285_v56, %v682_v52  ;;  %v774_v55 = vpop.f32.mrf.mxu3  ;;  %871 = vadd.xlane.f32.xlu2 %v870_v53  ;;  %v873_v57 = vsel %vm836_vm2, %v832_v51, 0.0 }
 0x160   : > { %v775_v58 = vadd.f32 %v1285_v56, %v774_v55  ;;  %v797_v59 = vpop.f32.mrf.mxu1  ;;  %874 = vadd.xlane.f32.xlu0 %v873_v57  ;;  %v954_v55 = vadd.s32 4294967224, %v1340_v17 }
 0x161   : > { %v810_v61 = vmax.f32 %v683_v54, 0.0  ;;  %v798_v62 = vadd.f32 %v1285_v56, %v797_v59 }
 0x162   : > { %v814_v63 = vmax.f32 %v775_v58, 0.0 }
 0x163   : > { %v830_v0 = vmul.f32 %v1291_v60, %v810_v61  ;;  %v815_v1 = vmax.f32 %v798_v62, 0.0  ;;  %v958_v62 = vadd.s32 4294967216, %v1340_v17 }
 0x164   : > { %v834_v2 = vmul.f32 %v1291_v60, %v814_v63 }
 0x165   : > { %v867_v3 = vsel %vm836_vm2, %v830_v0, 0.0  ;;  %v835_v4 = vmul.f32 %v1291_v60, %v815_v1 }
 0x166   : > { %v751_v5 = vpop.f32.mrf.mxu2  ;;  %868 = vadd.xlane.f32.xlu1 %v867_v3  ;;  %v879_v6 = vsel %vm836_vm2, %v834_v2, 0.0  ;;  %v962_v2 = vadd.s32 4294967208, %v1340_v17 }
 0x167   : > { %v752_v7 = vadd.f32 %v1285_v56, %v751_v5  ;;  %880 = vadd.xlane.f32.xlu2 %v879_v6  ;;  %v882_v8 = vsel %vm836_vm2, %v835_v4, 0.0 }
 0x168   : > { %883 = vadd.xlane.f32.xlu0 %v882_v8 }
 0x169   : > { %v813_v9 = vmax.f32 %v752_v7, 0.0  ;;  %v966_v7 = vadd.s32 4294967200, %v1340_v17 }
 0x16b   : > { %v833_v10 = vmul.f32 %v1291_v60, %v813_v9 }
 0x16d   : > { %v876_v11 = vsel %vm836_vm2, %v833_v10, 0.0 }
 0x16e   : > { %877 = vadd.xlane.f32.xlu1 %v876_v11 }
 0x193   : > { %v839_v12 = vpop.xlane.xlu0 %838 }
 0x194   : > { %v887_v19 = vadd.f32 %v1342_v18, %v839_v12 }
 0x196   : > { %v921_v25 = vperm.slane %v887_v19, %v1340_v17 }
 0x1a1   : > { %v842_v14 = vpop.xlane.xlu0 %841 }
 0x1a2   : > { %v888_v60 = vadd.f32 %v1342_v18, %v842_v14 }
 0x1a4   : > { %v923_v26 = vperm.slane %v888_v60, %v922_v20 }
 0x1a6   : > { %v925_v31 = vsel %vm924_vm3, %v923_v26, %v921_v25 }
 0x1a9   : > { %v845_v16 = vpop.xlane.xlu1 %844 }
 0x1aa   : > { %v889_v23 = vadd.f32 %v1342_v18, %v845_v16  ;;  %v978_v16 = vadd.s32 4294967176, %v1340_v17 }
 0x1ac   : > { %v927_v29 = vperm.slane %v889_v23, %v926_v22 }
 0x1ae   : > { %v929_v38 = vsel %vm928_vm4, %v927_v29, %v925_v31 }
 0x1b1   : > { %v848_v24 = vpop.xlane.xlu1 %847 }
 0x1b2   : > { %v890_v28 = vadd.f32 %v1342_v18, %v848_v24 }
 0x1b4   : > { %v931_v35 = vperm.slane %v890_v28, %v930_v27 }
 0x1b6   : > { %v933_v42 = vsel %vm932_vm5, %v931_v35, %v929_v38 }
 0x1b9   : > { %v851_v13 = vpop.xlane.xlu2 %850 }
 0x1ba   : > { %v891_v33 = vadd.f32 %v1342_v18, %v851_v13  ;;  %v974_v13 = vadd.s32 4294967184, %v1340_v17 }
 0x1bc   : > { %v935_v39 = vperm.slane %v891_v33, %v934_v32 }
 0x1be   : > { %v937_v48 = vsel %vm936_vm6, %v935_v39, %v933_v42 }
 0x1c1   : > { %v854_v56 = vpop.xlane.xlu2 %853 }
 0x1c2   : > { %v892_v37 = vadd.f32 %v1342_v18, %v854_v56 }
 0x1c3   : > { %v857_v21 = vpop.xlane.xlu0 %856 }
 0x1c4   : > { %v893_v41 = vadd.f32 %v1342_v18, %v857_v21  ;;  %v939_v43 = vperm.slane %v892_v37, %v938_v36 }
 0x1c6   : > { %v943_v49 = vperm.slane %v893_v41, %v942_v40  ;;  %v941_v53 = vsel %vm940_vm7, %v939_v43, %v937_v48 }
 0x1c8   : > { %v945_v58 = vsel %vm944_vm8, %v943_v49, %v941_v53 }
 0x1c9   : > { %v863_v30 = vpop.xlane.xlu2 %862 }
 0x1ca   : > { %v895_v51 = vadd.f32 %v1342_v18, %v863_v30 }
 0x1cb   : > { %v866_v34 = vpop.xlane.xlu0 %865 }
 0x1cc   : > { %v896_v57 = vadd.f32 %v1342_v18, %v866_v34  ;;  %v951_v59 = vperm.slane %v895_v51, %v950_v50 }
 0x1ce   : > { %v955_v0 = vperm.slane %v896_v57, %v954_v55 }
 0x1d1   : > { %v860_v45 = vpop.xlane.xlu1 %859 }
 0x1d2   : > { %v894_v46 = vadd.f32 %v1342_v18, %v860_v45  ;;  %v872_v47 = vpop.xlane.xlu2 %871 }
 0x1d3   : > { %v875_v52 = vpop.xlane.xlu0 %874  ;;  %v898_v3 = vadd.f32 %v1342_v18, %v872_v47 }
 0x1d4   : > { %v947_v54 = vperm.slane %v894_v46, %v946_v44  ;;  %v899_v8 = vadd.f32 %v1342_v18, %v875_v52 }
 0x1d5   : > { %v963_v11 = vperm.slane %v898_v3, %v962_v2 }
 0x1d6   : > { %v949_v61 = vsel %vm948_vm9, %v947_v54, %v945_v58  ;;  %v967_v19 = vperm.slane %v899_v8, %v966_v7 }
 0x1d7   : > { %v953_v4 = vsel %vm952_vm10, %v951_v59, %v949_v61 }
 0x1d8   : > { %v957_v10 = vsel %vm956_vm11, %v955_v0, %v953_v4 }
 0x1d9   : > { %v869_v63 = vpop.xlane.xlu1 %868 }
 0x1da   : > { %v897_v1 = vadd.f32 %v1342_v18, %v869_v63  ;;  %v881_v6 = vpop.xlane.xlu2 %880 }
 0x1db   : > { %v884_v9 = vpop.xlane.xlu0 %883  ;;  %v901_v14 = vadd.f32 %v1342_v18, %v881_v6 }
 0x1dc   : > { %v959_v5 = vperm.slane %v897_v1, %v958_v62  ;;  %v902_v56 = vadd.f32 %v1342_v18, %v884_v9 }
 0x1dd   : > { %v975_v22 = vperm.slane %v901_v14, %v974_v13 }
 0x1de   : > { %v961_v12 = vsel %vm960_vm12, %v959_v5, %v957_v10  ;;  %v979_v24 = vperm.slane %v902_v56, %v978_v16 }
 0x1df   : > { %v965_v60 = vsel %vm964_vm13, %v963_v11, %v961_v12 }
 0x1e0   : > { %v969_v25 = vsel %vm968_vm14, %v967_v19, %v965_v60 }
 0x1e1   : > { %v878_v20 = vpop.xlane.xlu1 %877 }
 0x1e2   : > { %v900_v21 = vadd.f32 %v1342_v18, %v878_v20 }
 0x1e4   : > { %v971_v23 = vperm.slane %v900_v21, %v970_v15 }
 0x1e6   : > { %v973_v26 = vsel %vm972_vm15, %v971_v23, %v969_v25 }
 0x1e7   : > { %v977_v17 = vsel %vm976_vm0, %v975_v22, %v973_v26 }
 0x1e8   : > { %v981_v27 = vsel %vm980_vm1, %v979_v24, %v977_v17 }
 0x1e9   : > { %983 = vst [vmem:[%s272_s8] sm:$0x1] %v981_v27 }
 0x1ea PF: > { %s17_s23 = sadd.s32 1, %s1126_s23  }
 0x1eb   : > { %p14_p5 = scmp.ge.s32.totalorder %s17_s23, 4  }
 0x1ed   :  { %16 = sbr.rel (!%p14_p5) target bundleno = 2 (0x2), region = 77 }

</bundles_post_ra>
